<compile_context>
chip_gen: v7x
topology: tpu7x:2x2x1
jax: 0.10.0
libtpu: 0.0.40
codegen_flags: <defaults>
</compile_context>

<pallas_src>
import functools

import jax
import jax.numpy as jnp
from jax.experimental import pallas as pl
from jax.experimental.pallas import tpu as pltpu


FC_DIMS = ((16, 16), (16, 8), (8, 2))     # (in, out) of fc1 / fc2 / fc3


def layer_cfgs(c_in):
    # (kernel, stride, padding, Cin, Cout) of the 4 depthwise-separable blocks
    return (
        (8, 2, 3, c_in, 128),
        (4, 4, 2, 128, 64),
        (4, 4, 2, 64, 32),
        (4, 4, 0, 32, 16),
    )


def build_layer_meta(c_in, L):
    """Static per-layer geometry + packed-weight row offsets."""
    metas = []
    w_off = 0
    lin = L
    for i, (K, S, P, Cin, Cout) in enumerate(layer_cfgs(c_in)):
        lp = lin + 2 * P
        lout = (lp - K) // S + 1
        metas.append(dict(K=K, S=S, P=P, Cin=Cin, Cout=Cout,
                          Lin=lin, Lout=lout, w_off=w_off, b_row=i))
        w_off += K * Cin
        lin = lout
    fc_meta = []
    for j, (din, dout) in enumerate(FC_DIMS):
        fc_meta.append(dict(din=din, dout=dout, w_off=w_off, b_row=4 + j))
        w_off += din
    if lin != 1:  # fc1 expects exactly 16 = Cout4 * 1 inputs after Flatten
        raise ValueError(f"conv chain must end at length 1, got {lin}")
    for m in metas[1:]:   # the strided-row im2col below relies on K == S
        if m["K"] != m["S"]:
            raise ValueError("layers 2-4 must have kernel == stride")
    rows_padded = ((w_off + 15) // 16) * 16   # clean (16,128) bf16 tiling
    return tuple(metas), tuple(fc_meta), rows_padded


# --------------------------- fused forward kernel ----------------------------
def _cnneeg_kernel(x_ref, w_ref, b_ref, o_ref, *pad_refs, metas, fc_meta, BT):
    # x_ref : (BT*Lout1, K1*Cin1) bf16   -- layer-1 im2col, done in the wrapper
    # w_ref : (rows_padded, 128)  bf16   -- all fused conv + fc weights
    # b_ref : (8, 128)            f32    -- all biases (rows 0-3 conv, 4-6 fc)
    # o_ref : (BT, 2)             f32
    # pad_refs: one f32 VMEM pad buffer per K==S block (layers 2-4)

    # ---- layer 1: one MXU matmul on the pre-gathered input ------------------
    m1 = metas[0]
    w1 = w_ref[m1["w_off"]:m1["w_off"] + m1["K"] * m1["Cin"], :m1["Cout"]]
    b1 = b_ref[m1["b_row"]:m1["b_row"] + 1, :m1["Cout"]]
    act = jnp.dot(x_ref[...], w1, preferred_element_type=jnp.float32) + b1
    lin = m1["Lout"]                                   # act is (BT*lin, Cout1)

    # ---- layers 2-4: K == S, only the first K*Lout padded rows are read -----
    for li, m in enumerate(metas[1:]):
        K, P = m["K"], m["P"]
        Cin, Cout, Lout = m["Cin"], m["Cout"], m["Lout"]
        rows = K * Lout                                # effective padded rows
        pad = pad_refs[li]
        n_data = min(m["Lin"], rows - P)               # data rows inside [0,rows)
        trail = rows - (P + n_data)

        for b in range(BT):
            base = b * rows
            if P > 0:                                  # zero ONLY boundary rows
                pad[pl.ds(base, P), :] = jnp.zeros((P, Cin), jnp.float32)
            if trail > 0:
                pad[pl.ds(base + P + n_data, trail), :] = (
                    jnp.zeros((trail, Cin), jnp.float32))
            pad[pl.ds(base + P, n_data), :] = act[b * lin:b * lin + n_data, :]

        # K accumulated matmuls over globally strided row slices (stride == K).
        # Per-batch row count == K*Lout, so one strided slice spans all batches.
        acc = jnp.zeros((BT * Lout, Cout), jnp.float32)
        for k in range(K):
            xk = pad[pl.ds(k, BT * Lout, K), :].astype(jnp.bfloat16)
            wk = w_ref[m["w_off"] + k * Cin:m["w_off"] + (k + 1) * Cin, :Cout]
            acc = acc + jnp.dot(xk, wk, preferred_element_type=jnp.float32)
        act = acc + b_ref[m["b_row"]:m["b_row"] + 1, :Cout]
        lin = Lout

    # ---- FC head: fc1 -> fc2 -> fc3 -> softmax, all VMEM-resident -----------
    h = act                                            # (BT, 16) f32
    for m in fc_meta:
        w = w_ref[m["w_off"]:m["w_off"] + m["din"], :m["dout"]]
        bias = b_ref[m["b_row"]:m["b_row"] + 1, :m["dout"]]
        h = jnp.dot(h.astype(jnp.bfloat16), w,
                    preferred_element_type=jnp.float32) + bias
    mx = jnp.max(h, axis=-1, keepdims=True)
    e = jnp.exp(h - mx)
    o_ref[...] = (e / jnp.sum(e, axis=-1, keepdims=True)).astype(o_ref.dtype)


def make_forward(c_in, L, B, BT=None):
    metas, fc_meta, rows_padded = build_layer_meta(c_in, L)
    if BT is None:
        BT = B
    assert B % BT == 0
    m1 = metas[0]
    K1, S1, P1, Lout1 = m1["K"], m1["S"], m1["P"], m1["Lout"]

    kern = functools.partial(_cnneeg_kernel, metas=metas, fc_meta=fc_meta, BT=BT)
    scratch = [pltpu.VMEM((BT * m["K"] * m["Lout"], m["Cin"]), jnp.float32)
               for m in metas[1:]]

    call = pl.pallas_call(
        kern,
        out_shape=jax.ShapeDtypeStruct((B, 2), jnp.float32),
        grid=(B // BT,),
        in_specs=[
            pl.BlockSpec((BT * Lout1, K1 * c_in), lambda i: (i, 0)),
            pl.BlockSpec((rows_padded, 128), lambda i: (0, 0)),   # resident
            pl.BlockSpec((8, 128), lambda i: (0, 0)),             # resident
        ],
        out_specs=pl.BlockSpec((BT, 2), lambda i: (i, 0)),
        scratch_shapes=scratch,
        compiler_params=pltpu.CompilerParams(
            dimension_semantics=("parallel",)),
    )

    @jax.jit
    def forward(x_ncl, wpack, bpack):
        # PyTorch NCL input -> channel-last, then layer-1 im2col in XLA
        # (free gather on a ~4 KB array); result is a lane-dense 2-D bf16 slab.
        x = jnp.transpose(x_ncl, (0, 2, 1)).astype(jnp.float32)   # (B, L, C)
        xp = jnp.pad(x, ((0, 0), (P1, P1), (0, 0)))
        idx = S1 * jnp.arange(Lout1)[:, None] + jnp.arange(K1)[None, :]
        xcol = xp[:, idx, :]                                      # (B,Lout1,K1,C)
        xcol = xcol.reshape(B * Lout1, K1 * c_in).astype(jnp.bfloat16)
        return call(xcol, wpack, bpack)

    return forward, metas, fc_meta, rows_padded


# ----------------------- params: init, fold & pack ---------------------------
def init_params(key, c_in):
    keys = iter(jax.random.split(key, 32))
    params = {"convs": [], "fcs": []}
    for (K, S, P, Cin, Cout) in layer_cfgs(c_in):
        params["convs"].append({
            "wd": 0.3 * jax.random.normal(next(keys), (K, Cin), jnp.float32),
            "bd": 0.1 * jax.random.normal(next(keys), (1, Cin), jnp.float32),
            "wp": 0.1 * jax.random.normal(next(keys), (Cin, Cout), jnp.float32),
            "bp": 0.1 * jax.random.normal(next(keys), (1, Cout), jnp.float32),
        })
    for (din, dout) in FC_DIMS:
        params["fcs"].append({
            "w": 0.2 * jax.random.normal(next(keys), (din, dout), jnp.float32),
            "b": 0.1 * jax.random.normal(next(keys), (1, dout), jnp.float32),
        })
    return params


def pack_params(params, metas, fc_meta, rows_padded):
    """Fold depthwise into pointwise (exact) and pack into a bf16 weight slab
    plus an f32 bias slab."""
    wpack = jnp.zeros((rows_padded, 128), jnp.float32)
    bpack = jnp.zeros((8, 128), jnp.float32)
    for m, p in zip(metas, params["convs"]):
        K, Cin, Cout = m["K"], m["Cin"], m["Cout"]
        wf = (p["wd"][:, :, None] * p["wp"][None, :, :]).reshape(K * Cin, Cout)
        bf = p["bd"] @ p["wp"] + p["bp"]                       # (1, Cout)
        wpack = wpack.at[m["w_off"]:m["w_off"] + K * Cin, :Cout].set(wf)
        bpack = bpack.at[m["b_row"], :Cout].set(bf[0])
    for m, p in zip(fc_meta, params["fcs"]):
        wpack = wpack.at[m["w_off"]:m["w_off"] + m["din"], :m["dout"]].set(p["w"])
        bpack = bpack.at[m["b_row"], :m["dout"]].set(p["b"][0])
    return wpack.astype(jnp.bfloat16), bpack


# ----------------------- pure-JAX fp32 reference (for checking) --------------
def ref_forward(x_ncl, params, c_in):
    x = jnp.transpose(x_ncl, (0, 2, 1)).astype(jnp.float32)    # (B, L, C)
    for (K, S, P, Cin, Cout), p in zip(layer_cfgs(c_in), params["convs"]):
        Bq, Lin, _ = x.shape
        xp = jnp.pad(x, ((0, 0), (P, P), (0, 0)))
        Lout = (Lin + 2 * P - K) // S + 1
        acc = jnp.zeros((Bq, Lout, Cin), jnp.float32)
        for k in range(K):
            acc = acc + xp[:, k:k + S * (Lout - 1) + 1:S, :] * p["wd"][k]
        acc = acc + p["bd"]
        x = jnp.dot(acc, p["wp"]) + p["bp"]
    h = x.reshape(x.shape[0], -1)
    for p in params["fcs"]:
        h = h @ p["w"] + p["b"]
    return jax.nn.softmax(h, axis=-1)


if __name__ == "__main__":
    B, C_IN, L = 2, 4, 128   # L=128 -> conv chain lengths 64 -> 17 -> 5 -> 1
    key = jax.random.PRNGKey(0)
    kx, kp = jax.random.split(key)
    x = jax.random.normal(kx, (B, C_IN, L), jnp.float32)
    params = init_params(kp, C_IN)

    forward, metas, fc_meta, rows_padded = make_forward(C_IN, L, B)
    wpack, bpack = pack_params(params, metas, fc_meta, rows_padded)

    out = jax.block_until_ready(forward(x, wpack, bpack))

    assert out.shape == (B, 2)
    assert bool(jnp.all(jnp.abs(jnp.sum(out, axis=1) - 1.0) < 1e-3))
    ref = ref_forward(x, params, C_IN)
    assert bool(jnp.all(jnp.abs(out - ref) < 3e-2))
    print("KERNEL_OK")
</pallas_src>

<mosaic_0001>
module attributes {stable_mosaic.version = 11 : i64} {
  func.func @_cnneeg_kernel(%arg0: i32, %arg1: memref<128x32xbf16, #tpu.memory_space<vmem>>, %arg2: memref<976x128xbf16, #tpu.memory_space<vmem>>, %arg3: memref<8x128xf32, #tpu.memory_space<vmem>>, %arg4: memref<2x2xf32, #tpu.memory_space<vmem>>, %arg5: memref<136x128xf32, #tpu.memory_space<vmem>>, %arg6: memref<40x64xf32, #tpu.memory_space<vmem>>, %arg7: memref<8x32xf32, #tpu.memory_space<vmem>>) attributes {dimension_semantics = [#tpu.dimension_semantics<parallel>], iteration_bounds = array<i64: 1>, scalar_prefetch = 0 : i64, scratch_operands = 3 : i64, tpu.core_type = #tpu.core_type<tc>, window_params = [{transform_indices = @transform_0, window_bounds = array<i64: 128, 32>}, {pipeline_mode = #tpu.pipeline_mode<synchronous>, transform_indices = @transform_1, window_bounds = array<i64: 976, 128>}, {pipeline_mode = #tpu.pipeline_mode<synchronous>, transform_indices = @transform_2, window_bounds = array<i64: 8, 128>}, {transform_indices = @transform_3, window_bounds = array<i64: 2, 2>}]} {
    %c0 = arith.constant 0 : index
    %c0_0 = arith.constant 0 : index
    %0 = vector.load %arg2[%c0, %c0_0] : memref<976x128xbf16, #tpu.memory_space<vmem>>, vector<32x128xbf16>
    %c0_1 = arith.constant 0 : index
    %c0_2 = arith.constant 0 : index
    %1 = vector.load %arg3[%c0_1, %c0_2] : memref<8x128xf32, #tpu.memory_space<vmem>>, vector<1x128xf32>
    %c0_3 = arith.constant 0 : index
    %c0_4 = arith.constant 0 : index
    %2 = vector.load %arg1[%c0_3, %c0_4] : memref<128x32xbf16, #tpu.memory_space<vmem>>, vector<128x32xbf16>
    %cst = arith.constant dense<0.000000e+00> : vector<128x128xf32>
    %3 = tpu.matmul %2, %0, %cst {dimension_numbers = #tpu.dot_dimension_numbers<[1], [0], [0], [1], [0, 0, 1, 1], [], []>} : vector<128x32xbf16>, vector<32x128xbf16>, vector<128x128xf32> -> vector<128x128xf32>
    %4 = vector.broadcast %1 : vector<1x128xf32> to vector<128x128xf32>
    %5 = arith.addf %3, %4 : vector<128x128xf32>
    %cst_5 = arith.constant 0.000000e+00 : f32
    %6 = vector.broadcast %cst_5 : f32 to vector<2x128xf32>
    %c0_6 = arith.constant 0 : index
    %c0_7 = arith.constant 0 : index
    %7 = vector.load %arg5[%c0_6, %c0_7] : memref<136x128xf32, #tpu.memory_space<vmem>>, vector<2x128xf32>
    tpu.vector_store %arg5[%c0_6, %c0_7], %6 {strides = array<i32>} : memref<136x128xf32, #tpu.memory_space<vmem>>, vector<2x128xf32>,
    %cst_8 = arith.constant 0.000000e+00 : f32
    %8 = vector.broadcast %cst_8 : f32 to vector<2x128xf32>
    %c66 = arith.constant 66 : index
    %c0_9 = arith.constant 0 : index
    %9 = vector.load %arg5[%c66, %c0_9] : memref<136x128xf32, #tpu.memory_space<vmem>>, vector<2x128xf32>
    tpu.vector_store %arg5[%c66, %c0_9], %8 {strides = array<i32>} : memref<136x128xf32, #tpu.memory_space<vmem>>, vector<2x128xf32>,
    %10 = vector.extract_strided_slice %5 {offsets = [0, 0], sizes = [64, 128], strides = [1, 1]} : vector<128x128xf32> to vector<64x128xf32>
    %c2 = arith.constant 2 : index
    %c0_10 = arith.constant 0 : index
    %11 = vector.load %arg5[%c2, %c0_10] : memref<136x128xf32, #tpu.memory_space<vmem>>, vector<64x128xf32>
    tpu.vector_store %arg5[%c2, %c0_10], %10 {strides = array<i32>} : memref<136x128xf32, #tpu.memory_space<vmem>>, vector<64x128xf32>,
    %cst_11 = arith.constant 0.000000e+00 : f32
    %12 = vector.broadcast %cst_11 : f32 to vector<2x128xf32>
    %c68 = arith.constant 68 : index
    %c0_12 = arith.constant 0 : index
    %13 = vector.load %arg5[%c68, %c0_12] : memref<136x128xf32, #tpu.memory_space<vmem>>, vector<2x128xf32>
    tpu.vector_store %arg5[%c68, %c0_12], %12 {strides = array<i32>} : memref<136x128xf32, #tpu.memory_space<vmem>>, vector<2x128xf32>,
    %cst_13 = arith.constant 0.000000e+00 : f32
    %14 = vector.broadcast %cst_13 : f32 to vector<2x128xf32>
    %c134 = arith.constant 134 : index
    %c0_14 = arith.constant 0 : index
    %15 = vector.load %arg5[%c134, %c0_14] : memref<136x128xf32, #tpu.memory_space<vmem>>, vector<2x128xf32>
    tpu.vector_store %arg5[%c134, %c0_14], %14 {strides = array<i32>} : memref<136x128xf32, #tpu.memory_space<vmem>>, vector<2x128xf32>,
    %16 = vector.extract_strided_slice %5 {offsets = [64, 0], sizes = [64, 128], strides = [1, 1]} : vector<128x128xf32> to vector<64x128xf32>
    %c70 = arith.constant 70 : index
    %c0_15 = arith.constant 0 : index
    %17 = vector.load %arg5[%c70, %c0_15] : memref<136x128xf32, #tpu.memory_space<vmem>>, vector<64x128xf32>
    tpu.vector_store %arg5[%c70, %c0_15], %16 {strides = array<i32>} : memref<136x128xf32, #tpu.memory_space<vmem>>, vector<64x128xf32>,
    %cst_16 = arith.constant 0.000000e+00 : f32
    %18 = vector.broadcast %cst_16 : f32 to vector<34x64xf32>
    %c0_17 = arith.constant 0 : index
    %c0_18 = arith.constant 0 : index
    %19 = tpu.strided_load %arg5[%c0_17, %c0_18] {strides = array<i32: 4, 1>} : memref<136x128xf32, #tpu.memory_space<vmem>>, vector<34x128xf32>
    %20 = arith.truncf %19 : vector<34x128xf32> to vector<34x128xbf16>
    %c32 = arith.constant 32 : index
    %c0_19 = arith.constant 0 : index
    %21 = vector.load %arg2[%c32, %c0_19] : memref<976x128xbf16, #tpu.memory_space<vmem>>, vector<128x64xbf16>
    %cst_20 = arith.constant dense<0.000000e+00> : vector<34x64xf32>
    %22 = tpu.matmul %20, %21, %cst_20 {dimension_numbers = #tpu.dot_dimension_numbers<[1], [0], [0], [1], [0, 0, 1, 1], [], []>} : vector<34x128xbf16>, vector<128x64xbf16>, vector<34x64xf32> -> vector<34x64xf32>
    %23 = arith.addf %18, %22 : vector<34x64xf32>
    %c1 = arith.constant 1 : index
    %c0_21 = arith.constant 0 : index
    %24 = tpu.strided_load %arg5[%c1, %c0_21] {strides = array<i32: 4, 1>} : memref<136x128xf32, #tpu.memory_space<vmem>>, vector<34x128xf32>
    %25 = arith.truncf %24 : vector<34x128xf32> to vector<34x128xbf16>
    %c160 = arith.constant 160 : index
    %c0_22 = arith.constant 0 : index
    %26 = vector.load %arg2[%c160, %c0_22] : memref<976x128xbf16, #tpu.memory_space<vmem>>, vector<128x64xbf16>
    %cst_23 = arith.constant dense<0.000000e+00> : vector<34x64xf32>
    %27 = tpu.matmul %25, %26, %cst_23 {dimension_numbers = #tpu.dot_dimension_numbers<[1], [0], [0], [1], [0, 0, 1, 1], [], []>} : vector<34x128xbf16>, vector<128x64xbf16>, vector<34x64xf32> -> vector<34x64xf32>
    %28 = arith.addf %23, %27 : vector<34x64xf32>
    %c2_24 = arith.constant 2 : index
    %c0_25 = arith.constant 0 : index
    %29 = tpu.strided_load %arg5[%c2_24, %c0_25] {strides = array<i32: 4, 1>} : memref<136x128xf32, #tpu.memory_space<vmem>>, vector<34x128xf32>
    %30 = arith.truncf %29 : vector<34x128xf32> to vector<34x128xbf16>
    %c288 = arith.constant 288 : index
    %c0_26 = arith.constant 0 : index
    %31 = vector.load %arg2[%c288, %c0_26] : memref<976x128xbf16, #tpu.memory_space<vmem>>, vector<128x64xbf16>
    %cst_27 = arith.constant dense<0.000000e+00> : vector<34x64xf32>
    %32 = tpu.matmul %30, %31, %cst_27 {dimension_numbers = #tpu.dot_dimension_numbers<[1], [0], [0], [1], [0, 0, 1, 1], [], []>} : vector<34x128xbf16>, vector<128x64xbf16>, vector<34x64xf32> -> vector<34x64xf32>
    %33 = arith.addf %28, %32 : vector<34x64xf32>
    %c3 = arith.constant 3 : index
    %c0_28 = arith.constant 0 : index
    %34 = tpu.strided_load %arg5[%c3, %c0_28] {strides = array<i32: 4, 1>} : memref<136x128xf32, #tpu.memory_space<vmem>>, vector<34x128xf32>
    %35 = arith.truncf %34 : vector<34x128xf32> to vector<34x128xbf16>
    %c416 = arith.constant 416 : index
    %c0_29 = arith.constant 0 : index
    %36 = vector.load %arg2[%c416, %c0_29] : memref<976x128xbf16, #tpu.memory_space<vmem>>, vector<128x64xbf16>
    %cst_30 = arith.constant dense<0.000000e+00> : vector<34x64xf32>
    %37 = tpu.matmul %35, %36, %cst_30 {dimension_numbers = #tpu.dot_dimension_numbers<[1], [0], [0], [1], [0, 0, 1, 1], [], []>} : vector<34x128xbf16>, vector<128x64xbf16>, vector<34x64xf32> -> vector<34x64xf32>
    %38 = arith.addf %33, %37 : vector<34x64xf32>
    %c1_31 = arith.constant 1 : index
    %c0_32 = arith.constant 0 : index
    %39 = vector.load %arg3[%c1_31, %c0_32] : memref<8x128xf32, #tpu.memory_space<vmem>>, vector<1x64xf32>
    %40 = vector.broadcast %39 : vector<1x64xf32> to vector<34x64xf32>
    %41 = arith.addf %38, %40 : vector<34x64xf32>
    %cst_33 = arith.constant 0.000000e+00 : f32
    %42 = vector.broadcast %cst_33 : f32 to vector<2x64xf32>
    %c0_34 = arith.constant 0 : index
    %c0_35 = arith.constant 0 : index
    %43 = vector.load %arg6[%c0_34, %c0_35] : memref<40x64xf32, #tpu.memory_space<vmem>>, vector<2x64xf32>
    tpu.vector_store %arg6[%c0_34, %c0_35], %42 {strides = array<i32>} : memref<40x64xf32, #tpu.memory_space<vmem>>, vector<2x64xf32>,
    %cst_36 = arith.constant 0.000000e+00 : f32
    %44 = vector.broadcast %cst_36 : f32 to vector<1x64xf32>
    %c19 = arith.constant 19 : index
    %c0_37 = arith.constant 0 : index
    %45 = vector.load %arg6[%c19, %c0_37] : memref<40x64xf32, #tpu.memory_space<vmem>>, vector<1x64xf32>
    tpu.vector_store %arg6[%c19, %c0_37], %44 {strides = array<i32>} : memref<40x64xf32, #tpu.memory_space<vmem>>, vector<1x64xf32>,
    %46 = vector.extract_strided_slice %41 {offsets = [0, 0], sizes = [17, 64], strides = [1, 1]} : vector<34x64xf32> to vector<17x64xf32>
    %c2_38 = arith.constant 2 : index
    %c0_39 = arith.constant 0 : index
    %47 = vector.load %arg6[%c2_38, %c0_39] : memref<40x64xf32, #tpu.memory_space<vmem>>, vector<17x64xf32>
    tpu.vector_store %arg6[%c2_38, %c0_39], %46 {strides = array<i32>} : memref<40x64xf32, #tpu.memory_space<vmem>>, vector<17x64xf32>,
    %cst_40 = arith.constant 0.000000e+00 : f32
    %48 = vector.broadcast %cst_40 : f32 to vector<2x64xf32>
    %c20 = arith.constant 20 : index
    %c0_41 = arith.constant 0 : index
    %49 = vector.load %arg6[%c20, %c0_41] : memref<40x64xf32, #tpu.memory_space<vmem>>, vector<2x64xf32>
    tpu.vector_store %arg6[%c20, %c0_41], %48 {strides = array<i32>} : memref<40x64xf32, #tpu.memory_space<vmem>>, vector<2x64xf32>,
    %cst_42 = arith.constant 0.000000e+00 : f32
    %50 = vector.broadcast %cst_42 : f32 to vector<1x64xf32>
    %c39 = arith.constant 39 : index
    %c0_43 = arith.constant 0 : index
    %51 = vector.load %arg6[%c39, %c0_43] : memref<40x64xf32, #tpu.memory_space<vmem>>, vector<1x64xf32>
    tpu.vector_store %arg6[%c39, %c0_43], %50 {strides = array<i32>} : memref<40x64xf32, #tpu.memory_space<vmem>>, vector<1x64xf32>,
    %52 = vector.extract_strided_slice %41 {offsets = [17, 0], sizes = [17, 64], strides = [1, 1]} : vector<34x64xf32> to vector<17x64xf32>
    %c22 = arith.constant 22 : index
    %c0_44 = arith.constant 0 : index
    %53 = vector.load %arg6[%c22, %c0_44] : memref<40x64xf32, #tpu.memory_space<vmem>>, vector<17x64xf32>
    tpu.vector_store %arg6[%c22, %c0_44], %52 {strides = array<i32>} : memref<40x64xf32, #tpu.memory_space<vmem>>, vector<17x64xf32>,
    %cst_45 = arith.constant 0.000000e+00 : f32
    %54 = vector.broadcast %cst_45 : f32 to vector<10x32xf32>
    %c0_46 = arith.constant 0 : index
    %c0_47 = arith.constant 0 : index
    %55 = tpu.strided_load %arg6[%c0_46, %c0_47] {strides = array<i32: 4, 1>} : memref<40x64xf32, #tpu.memory_space<vmem>>, vector<10x64xf32>
    %56 = arith.truncf %55 : vector<10x64xf32> to vector<10x64xbf16>
    %c544 = arith.constant 544 : index
    %c0_48 = arith.constant 0 : index
    %57 = vector.load %arg2[%c544, %c0_48] : memref<976x128xbf16, #tpu.memory_space<vmem>>, vector<64x32xbf16>
    %cst_49 = arith.constant dense<0.000000e+00> : vector<10x32xf32>
    %58 = tpu.matmul %56, %57, %cst_49 {dimension_numbers = #tpu.dot_dimension_numbers<[1], [0], [0], [1], [0, 0, 1, 1], [], []>} : vector<10x64xbf16>, vector<64x32xbf16>, vector<10x32xf32> -> vector<10x32xf32>
    %59 = arith.addf %54, %58 : vector<10x32xf32>
    %c1_50 = arith.constant 1 : index
    %c0_51 = arith.constant 0 : index
    %60 = tpu.strided_load %arg6[%c1_50, %c0_51] {strides = array<i32: 4, 1>} : memref<40x64xf32, #tpu.memory_space<vmem>>, vector<10x64xf32>
    %61 = arith.truncf %60 : vector<10x64xf32> to vector<10x64xbf16>
    %c608 = arith.constant 608 : index
    %c0_52 = arith.constant 0 : index
    %62 = vector.load %arg2[%c608, %c0_52] : memref<976x128xbf16, #tpu.memory_space<vmem>>, vector<64x32xbf16>
    %cst_53 = arith.constant dense<0.000000e+00> : vector<10x32xf32>
    %63 = tpu.matmul %61, %62, %cst_53 {dimension_numbers = #tpu.dot_dimension_numbers<[1], [0], [0], [1], [0, 0, 1, 1], [], []>} : vector<10x64xbf16>, vector<64x32xbf16>, vector<10x32xf32> -> vector<10x32xf32>
    %64 = arith.addf %59, %63 : vector<10x32xf32>
    %c2_54 = arith.constant 2 : index
    %c0_55 = arith.constant 0 : index
    %65 = tpu.strided_load %arg6[%c2_54, %c0_55] {strides = array<i32: 4, 1>} : memref<40x64xf32, #tpu.memory_space<vmem>>, vector<10x64xf32>
    %66 = arith.truncf %65 : vector<10x64xf32> to vector<10x64xbf16>
    %c672 = arith.constant 672 : index
    %c0_56 = arith.constant 0 : index
    %67 = vector.load %arg2[%c672, %c0_56] : memref<976x128xbf16, #tpu.memory_space<vmem>>, vector<64x32xbf16>
    %cst_57 = arith.constant dense<0.000000e+00> : vector<10x32xf32>
    %68 = tpu.matmul %66, %67, %cst_57 {dimension_numbers = #tpu.dot_dimension_numbers<[1], [0], [0], [1], [0, 0, 1, 1], [], []>} : vector<10x64xbf16>, vector<64x32xbf16>, vector<10x32xf32> -> vector<10x32xf32>
    %69 = arith.addf %64, %68 : vector<10x32xf32>
    %c3_58 = arith.constant 3 : index
    %c0_59 = arith.constant 0 : index
    %70 = tpu.strided_load %arg6[%c3_58, %c0_59] {strides = array<i32: 4, 1>} : memref<40x64xf32, #tpu.memory_space<vmem>>, vector<10x64xf32>
    %71 = arith.truncf %70 : vector<10x64xf32> to vector<10x64xbf16>
    %c736 = arith.constant 736 : index
    %c0_60 = arith.constant 0 : index
    %72 = vector.load %arg2[%c736, %c0_60] : memref<976x128xbf16, #tpu.memory_space<vmem>>, vector<64x32xbf16>
    %cst_61 = arith.constant dense<0.000000e+00> : vector<10x32xf32>
    %73 = tpu.matmul %71, %72, %cst_61 {dimension_numbers = #tpu.dot_dimension_numbers<[1], [0], [0], [1], [0, 0, 1, 1], [], []>} : vector<10x64xbf16>, vector<64x32xbf16>, vector<10x32xf32> -> vector<10x32xf32>
    %74 = arith.addf %69, %73 : vector<10x32xf32>
    %c2_62 = arith.constant 2 : index
    %c0_63 = arith.constant 0 : index
    %75 = vector.load %arg3[%c2_62, %c0_63] : memref<8x128xf32, #tpu.memory_space<vmem>>, vector<1x32xf32>
    %76 = vector.broadcast %75 : vector<1x32xf32> to vector<10x32xf32>
    %77 = arith.addf %74, %76 : vector<10x32xf32>
    %78 = vector.extract_strided_slice %77 {offsets = [0, 0], sizes = [4, 32], strides = [1, 1]} : vector<10x32xf32> to vector<4x32xf32>
    %c0_64 = arith.constant 0 : index
    %c0_65 = arith.constant 0 : index
    %79 = vector.load %arg7[%c0_64, %c0_65] : memref<8x32xf32, #tpu.memory_space<vmem>>, vector<4x32xf32>
    tpu.vector_store %arg7[%c0_64, %c0_65], %78 {strides = array<i32>} : memref<8x32xf32, #tpu.memory_space<vmem>>, vector<4x32xf32>,
    %80 = vector.extract_strided_slice %77 {offsets = [5, 0], sizes = [4, 32], strides = [1, 1]} : vector<10x32xf32> to vector<4x32xf32>
    %c4 = arith.constant 4 : index
    %c0_66 = arith.constant 0 : index
    %81 = vector.load %arg7[%c4, %c0_66] : memref<8x32xf32, #tpu.memory_space<vmem>>, vector<4x32xf32>
    tpu.vector_store %arg7[%c4, %c0_66], %80 {strides = array<i32>} : memref<8x32xf32, #tpu.memory_space<vmem>>, vector<4x32xf32>,
    %cst_67 = arith.constant 0.000000e+00 : f32
    %82 = vector.broadcast %cst_67 : f32 to vector<2x16xf32>
    %c0_68 = arith.constant 0 : index
    %c0_69 = arith.constant 0 : index
    %83 = tpu.strided_load %arg7[%c0_68, %c0_69] {strides = array<i32: 4, 1>} : memref<8x32xf32, #tpu.memory_space<vmem>>, vector<2x32xf32>
    %84 = arith.truncf %83 : vector<2x32xf32> to vector<2x32xbf16>
    %c800 = arith.constant 800 : index
    %c0_70 = arith.constant 0 : index
    %85 = vector.load %arg2[%c800, %c0_70] : memref<976x128xbf16, #tpu.memory_space<vmem>>, vector<32x16xbf16>
    %cst_71 = arith.constant dense<0.000000e+00> : vector<2x16xf32>
    %86 = tpu.matmul %84, %85, %cst_71 {dimension_numbers = #tpu.dot_dimension_numbers<[1], [0], [0], [1], [0, 0, 1, 1], [], []>} : vector<2x32xbf16>, vector<32x16xbf16>, vector<2x16xf32> -> vector<2x16xf32>
    %87 = arith.addf %82, %86 : vector<2x16xf32>
    %c1_72 = arith.constant 1 : index
    %c0_73 = arith.constant 0 : index
    %88 = tpu.strided_load %arg7[%c1_72, %c0_73] {strides = array<i32: 4, 1>} : memref<8x32xf32, #tpu.memory_space<vmem>>, vector<2x32xf32>
    %89 = arith.truncf %88 : vector<2x32xf32> to vector<2x32xbf16>
    %c832 = arith.constant 832 : index
    %c0_74 = arith.constant 0 : index
    %90 = vector.load %arg2[%c832, %c0_74] : memref<976x128xbf16, #tpu.memory_space<vmem>>, vector<32x16xbf16>
    %cst_75 = arith.constant dense<0.000000e+00> : vector<2x16xf32>
    %91 = tpu.matmul %89, %90, %cst_75 {dimension_numbers = #tpu.dot_dimension_numbers<[1], [0], [0], [1], [0, 0, 1, 1], [], []>} : vector<2x32xbf16>, vector<32x16xbf16>, vector<2x16xf32> -> vector<2x16xf32>
    %92 = arith.addf %87, %91 : vector<2x16xf32>
    %c2_76 = arith.constant 2 : index
    %c0_77 = arith.constant 0 : index
    %93 = tpu.strided_load %arg7[%c2_76, %c0_77] {strides = array<i32: 4, 1>} : memref<8x32xf32, #tpu.memory_space<vmem>>, vector<2x32xf32>
    %94 = arith.truncf %93 : vector<2x32xf32> to vector<2x32xbf16>
    %c864 = arith.constant 864 : index
    %c0_78 = arith.constant 0 : index
    %95 = vector.load %arg2[%c864, %c0_78] : memref<976x128xbf16, #tpu.memory_space<vmem>>, vector<32x16xbf16>
    %cst_79 = arith.constant dense<0.000000e+00> : vector<2x16xf32>
    %96 = tpu.matmul %94, %95, %cst_79 {dimension_numbers = #tpu.dot_dimension_numbers<[1], [0], [0], [1], [0, 0, 1, 1], [], []>} : vector<2x32xbf16>, vector<32x16xbf16>, vector<2x16xf32> -> vector<2x16xf32>
    %97 = arith.addf %92, %96 : vector<2x16xf32>
    %c3_80 = arith.constant 3 : index
    %c0_81 = arith.constant 0 : index
    %98 = tpu.strided_load %arg7[%c3_80, %c0_81] {strides = array<i32: 4, 1>} : memref<8x32xf32, #tpu.memory_space<vmem>>, vector<2x32xf32>
    %99 = arith.truncf %98 : vector<2x32xf32> to vector<2x32xbf16>
    %c896 = arith.constant 896 : index
    %c0_82 = arith.constant 0 : index
    %100 = vector.load %arg2[%c896, %c0_82] : memref<976x128xbf16, #tpu.memory_space<vmem>>, vector<32x16xbf16>
    %cst_83 = arith.constant dense<0.000000e+00> : vector<2x16xf32>
    %101 = tpu.matmul %99, %100, %cst_83 {dimension_numbers = #tpu.dot_dimension_numbers<[1], [0], [0], [1], [0, 0, 1, 1], [], []>} : vector<2x32xbf16>, vector<32x16xbf16>, vector<2x16xf32> -> vector<2x16xf32>
    %102 = arith.addf %97, %101 : vector<2x16xf32>
    %c3_84 = arith.constant 3 : index
    %c0_85 = arith.constant 0 : index
    %103 = vector.load %arg3[%c3_84, %c0_85] : memref<8x128xf32, #tpu.memory_space<vmem>>, vector<1x16xf32>
    %104 = vector.broadcast %103 : vector<1x16xf32> to vector<2x16xf32>
    %105 = arith.addf %102, %104 : vector<2x16xf32>
    %c928 = arith.constant 928 : index
    %c0_86 = arith.constant 0 : index
    %106 = vector.load %arg2[%c928, %c0_86] : memref<976x128xbf16, #tpu.memory_space<vmem>>, vector<16x16xbf16>
    %c4_87 = arith.constant 4 : index
    %c0_88 = arith.constant 0 : index
    %107 = vector.load %arg3[%c4_87, %c0_88] : memref<8x128xf32, #tpu.memory_space<vmem>>, vector<1x16xf32>
    %108 = arith.truncf %105 : vector<2x16xf32> to vector<2x16xbf16>
    %cst_89 = arith.constant dense<0.000000e+00> : vector<2x16xf32>
    %109 = tpu.matmul %108, %106, %cst_89 {dimension_numbers = #tpu.dot_dimension_numbers<[1], [0], [0], [1], [0, 0, 1, 1], [], []>} : vector<2x16xbf16>, vector<16x16xbf16>, vector<2x16xf32> -> vector<2x16xf32>
    %110 = vector.broadcast %107 : vector<1x16xf32> to vector<2x16xf32>
    %111 = arith.addf %109, %110 : vector<2x16xf32>
    %c944 = arith.constant 944 : index
    %c0_90 = arith.constant 0 : index
    %112 = vector.load %arg2[%c944, %c0_90] : memref<976x128xbf16, #tpu.memory_space<vmem>>, vector<16x8xbf16>
    %c5 = arith.constant 5 : index
    %c0_91 = arith.constant 0 : index
    %113 = vector.load %arg3[%c5, %c0_91] : memref<8x128xf32, #tpu.memory_space<vmem>>, vector<1x8xf32>
    %114 = arith.truncf %111 : vector<2x16xf32> to vector<2x16xbf16>
    %cst_92 = arith.constant dense<0.000000e+00> : vector<2x8xf32>
    %115 = tpu.matmul %114, %112, %cst_92 {dimension_numbers = #tpu.dot_dimension_numbers<[1], [0], [0], [1], [0, 0, 1, 1], [], []>} : vector<2x16xbf16>, vector<16x8xbf16>, vector<2x8xf32> -> vector<2x8xf32>
    %116 = vector.broadcast %113 : vector<1x8xf32> to vector<2x8xf32>
    %117 = arith.addf %115, %116 : vector<2x8xf32>
    %c960 = arith.constant 960 : index
    %c0_93 = arith.constant 0 : index
    %118 = vector.load %arg2[%c960, %c0_93] : memref<976x128xbf16, #tpu.memory_space<vmem>>, vector<8x2xbf16>
    %c6 = arith.constant 6 : index
    %c0_94 = arith.constant 0 : index
    %119 = vector.load %arg3[%c6, %c0_94] : memref<8x128xf32, #tpu.memory_space<vmem>>, vector<1x2xf32>
    %120 = arith.truncf %117 : vector<2x8xf32> to vector<2x8xbf16>
    %cst_95 = arith.constant dense<0.000000e+00> : vector<2x2xf32>
    %121 = tpu.matmul %120, %118, %cst_95 {dimension_numbers = #tpu.dot_dimension_numbers<[1], [0], [0], [1], [0, 0, 1, 1], [], []>} : vector<2x8xbf16>, vector<8x2xbf16>, vector<2x2xf32> -> vector<2x2xf32>
    %122 = vector.broadcast %119 : vector<1x2xf32> to vector<2x2xf32>
    %123 = arith.addf %121, %122 : vector<2x2xf32>
    %cst_96 = arith.constant dense<0xFF800000> : vector<2xf32>
    %124 = vector.multi_reduction <maximumf>, %123, %cst_96 [1] : vector<2x2xf32> to vector<2xf32>
    %125 = vector.shape_cast %124 : vector<2xf32> to vector<2x1xf32>
    %126 = vector.broadcast %125 : vector<2x1xf32> to vector<2x2xf32>
    %127 = arith.subf %123, %126 : vector<2x2xf32>
    %128 = math.exp %127 : vector<2x2xf32>
    %cst_97 = arith.constant dense<0.000000e+00> : vector<2xf32>
    %129 = vector.multi_reduction <add>, %128, %cst_97 [1] : vector<2x2xf32> to vector<2xf32>
    %130 = vector.shape_cast %129 : vector<2xf32> to vector<2x1xf32>
    %131 = vector.broadcast %130 : vector<2x1xf32> to vector<2x2xf32>
    %132 = arith.divf %128, %131 : vector<2x2xf32>
    %c0_98 = arith.constant 0 : index
    %c0_99 = arith.constant 0 : index
    %133 = vector.load %arg4[%c0_98, %c0_99] : memref<2x2xf32, #tpu.memory_space<vmem>>, vector<2x2xf32>
    tpu.vector_store %arg4[%c0_98, %c0_99], %132 {strides = array<i32>} : memref<2x2xf32, #tpu.memory_space<vmem>>, vector<2x2xf32>,
    return
  }
  func.func @transform_0(%arg0: i32) -> (i32, i32) {
    %c0_i32 = arith.constant 0 : i32
    %c0_i32_0 = arith.constant 0 : i32
    return %arg0, %c0_i32 : i32, i32
  }
  func.func @transform_1(%arg0: i32) -> (i32, i32) {
    %c0_i32 = arith.constant 0 : i32
    %c0_i32_0 = arith.constant 0 : i32
    %c0_i32_1 = arith.constant 0 : i32
    return %c0_i32, %c0_i32_0 : i32, i32
  }
  func.func @transform_2(%arg0: i32) -> (i32, i32) {
    %c0_i32 = arith.constant 0 : i32
    %c0_i32_0 = arith.constant 0 : i32
    %c0_i32_1 = arith.constant 0 : i32
    return %c0_i32, %c0_i32_0 : i32, i32
  }
  func.func @transform_3(%arg0: i32) -> (i32, i32) {
    %c0_i32 = arith.constant 0 : i32
    %c0_i32_0 = arith.constant 0 : i32
    return %arg0, %c0_i32 : i32, i32
  }
}

</mosaic_0001>

<bundles_post_ra>
// kernel: forward.1
= control target key start
LH: loop header
LB: loop body
LE: loop exit
PB: predicated region body
PF: predicated region fallthrough
CT: control target
= control target key end

     0   :  { %vm93_vm0 = vcmask 261120   ;;  %v2107_v3 = vmov 0.0   ;;  %s2529_s0 = inlined_call_operand.vmem [shape: bf16[128,32], index: 0, kind: input, shape index: {}]   ;;  %s2530_s1 = inlined_call_operand.vmem [shape: bf16[976,128], index: 1, kind: input, shape index: {}]   ;;  %s2531_s2 = inlined_call_operand.vmem [shape: f32[8,128], index: 2, kind: input, shape index: {}]   ;;  %s2532_s3 = inlined_call_operand.hbm [shape: f32[2,2], index: 3, kind: output, shape index: {}]  }
   0x1   :  { %v2011_v0 = vld [vmem:[%s2530_s1] sm:$0xff]   ;;  %v2012_v1 = vld [vmem:[%s2530_s1 + $0x8] sm:$0xff]   ;;  %1798 = vmatprep.subr.bf16.mxu1 %v2107_v3  ;;  %215 = vst [vmem:[#allocation2] sm:$0x3] %v2107_v3  ;;  %216 = vst [vmem:[#allocation2 + $0x42] sm:$0x3] %v2107_v3 }
   0x2   :  { %1778 = vmatprep.subr.bf16.mxu0 %v2011_v0  ;;  %v2013_v2 = vld [vmem:[%s2529_s0] sm:$0xff]   ;;  %225 = vst [vmem:[#allocation2 + $0x44] sm:$0x3] %v2107_v3  ;;  %226 = vst [vmem:[#allocation2 + $0x86] sm:$0x3] %v2107_v3  ;;  %v2014_v4 = vld [vmem:[%s2529_s0 + $0x8] sm:$0xff]  }
   0x3   :  { %1779 = vmatpush3.bf16.msra.mxu0 %v2011_v0  ;;  %1782 = vmatprep.mubr.msk.bf16.mxu0 %vm93_vm0, %v2013_v2  ;;  %v2015_v5 = vld [vmem:[%s2529_s0 + $0x10] sm:$0xff]   ;;  %v2016_v8 = vld [vmem:[%s2529_s0 + $0x18] sm:$0xff]   ;;  %v2017_v10 = vld [vmem:[%s2529_s0 + $0x20] sm:$0xff]  }
   0x4   :  { %1780 = vmatprep.subr.bf16.mxu0 %v2012_v1  ;;  %v2021_v6 = vld [vmem:[%s2530_s1 + $0x50] sm:$0xff]   ;;  %v2023_v9 = vld [vmem:[%s2530_s1 + $0x58] sm:$0xff]   ;;  %v2018_v12 = vld [vmem:[%s2529_s0 + $0x28] sm:$0xff]  }
   0x5   :  { %v2022_v7 = vld [vmem:[%s2530_s1 + $0x10] sm:$0xff]   ;;  %1799 = vmatpush3.bf16.msra.mxu1 %v2021_v6  ;;  %v2024_v11 = vld [vmem:[%s2530_s1 + $0x18] sm:$0xff]  }
   0x6   :  { %1800 = vmatprep.subr.bf16.mxu1 %v2107_v3  ;;  %v2019_v13 = vld [vmem:[%s2529_s0 + $0x30] sm:$0xff]   ;;  %v2020_v14 = vld [vmem:[%s2529_s0 + $0x38] sm:$0xff]  }
   0x7   :  { %1781 = vmatpush3.bf16.msra.mxu0 %v2012_v1 }
   0x8   :  { %1826 = vmatprep.subr.bf16.mxu0 %v2107_v3 }
   0x9   :  { %1801 = vmatpush3.bf16.msra.mxu1 %v2023_v9 }
   0xa   :  { %1783 = vmatmul.mubr.msk.bf16.vlgmr.msra.gmra.mrb[0].mxu0 %vm93_vm0, %v2014_v4  ;;  %1802 = vmatprep.subr.bf16.mxu1 %v2107_v3 }
   0xb   :  { %1786 = vmatprep.mubr.msk.bf16.mxu0 %vm93_vm0, %v2015_v5  ;;  %1827 = vmatpush3.bf16.msra.mxu0 %v2022_v7 }
   0xc   :  { %1828 = vmatprep.subr.bf16.mxu0 %v2107_v3 }
   0xf   :  { %1829 = vmatpush3.bf16.msra.mxu0 %v2024_v11 }
  0x10   :  { %1830 = vmatprep.subr.bf16.mxu0 %v2107_v3 }
  0x12   :  { %1787 = vmatmul.mubr.msk.bf16.gmra.mrb[4].mxu0 %vm93_vm0, %v2016_v8 }
  0x13   :  { %1790 = vmatprep.mubr.msk.bf16.mxu0 %vm93_vm0, %v2017_v10 }
  0x1a   :  { %1791 = vmatmul.mubr.msk.bf16.gmra.mrb[8].mxu0 %vm93_vm0, %v2018_v12 }
  0x1b   :  { %1794 = vmatprep.mubr.msk.bf16.mxu0 %vm93_vm0, %v2019_v13 }
  0x22   :  { %1795 = vmatmul.mubr.msk.bf16.gmra.mrb[12].mxu0 %vm93_vm0, %v2020_v14 }
  0x23   :  { %8 = vsyncpa [#allocation6], 0  ;;  %v2025_v15 = vld [vmem:[%s2530_s1 + $0x60] sm:$0xff]   ;;  %v2027_v17 = vld [vmem:[%s2530_s1 + $0x68] sm:$0xff]   ;;  %vm2108_vm1 = vmmov 0   ;;  %vm788_vm2 = vcmask 516096  }
  0x24   :  { %v2026_v16 = vld [vmem:[%s2530_s1 + $0x20] sm:$0xff]   ;;  %1803 = vmatpush3.bf16.msra.mxu1 %v2025_v15  ;;  %v2028_v18 = vld [vmem:[%s2530_s1 + $0x28] sm:$0xff]   ;;  %v2029_v19 = vld [vmem:[%s2530_s1 + $0x70] sm:$0xff]   ;;  %1814 = vmatprep.mubr.msk.bf16.mxu1 %vm2108_vm1, %v2107_v3  ;;  %789 = vst.msk [vmem:[#allocation3 + $0x13] sm:$0x1] %vm788_vm2, %v2107_v3  ;;  %vm786_vm3 = vcmask 517120  }
  0x25   :  { %1831 = vmatpush3.bf16.msra.mxu0 %v2026_v16  ;;  %1804 = vmatprep.subr.bf16.mxu1 %v2107_v3  ;;  %v2030_v20 = vld [vmem:[%s2530_s1 + $0x30] sm:$0xff]   ;;  %v2031_v21 = vld [vmem:[%s2530_s1 + $0x78] sm:$0xff]   ;;  %v2033_v23 = vld [vmem:[%s2530_s1 + $0x80] sm:$0xff]   ;;  %795 = vst.msk [vmem:[#allocation3 + $0x27] sm:$0x1] %vm788_vm2, %v2107_v3  ;;  %vm790_vm4 = vcmask 523264  }
  0x26   :  { %1832 = vmatprep.subr.bf16.mxu0 %v2107_v3  ;;  %v2032_v22 = vld [vmem:[%s2530_s1 + $0x38] sm:$0xff]   ;;  %v2034_v24 = vld [vmem:[%s2530_s1 + $0x40] sm:$0xff]   ;;  %v2035_v25 = vld [vmem:[%s2530_s1 + $0x88] sm:$0xff]   ;;  %1842 = vmatprep.mubr.msk.bf16.mxu0 %vm2108_vm1, %v2107_v3  ;;  %787 = vst.msk [vmem:[#allocation3] sm:$0x3] %vm786_vm3, %v2107_v3  ;;  %vm796_vm5 = vcmask 523265  }
  0x27   :  { %v2036_v26 = vld [vmem:[%s2530_s1 + $0x48] sm:$0xff]   ;;  %v2245_v27 = vld [vmem:[%s2531_s2] ss:$0 sm:$0xff]  ;;  %v2037_v53 = vld [vmem:[%s2530_s1 + $0x90] sm:$0xff]   ;;  %794 = vst.msk [vmem:[#allocation3 + $0x14] sm:$0x3] %vm786_vm3, %v2107_v3 }
  0x28   :  { %1805 = vmatpush3.bf16.msra.mxu1 %v2027_v17  ;;  %v2038_v54 = vld [vmem:[%s2530_s1 + $0xd0] sm:$0xff]   ;;  %v2039_v63 = vld [vmem:[%s2530_s1 + $0x98] sm:$0xff]   ;;  %v2041_v7 = vld [vmem:[%s2530_s1 + $0xa0] sm:$0xff]   ;;  %vm1134_vm6 = vcmask 257024   ;;  %vm1136_vm7 = vcmask 261125   ;;  %vm1138_vm8 = vcmask 253952  }
  0x29   :  { %1833 = vmatpush3.bf16.msra.mxu0 %v2028_v18  ;;  %1806 = vmatprep.subr.bf16.mxu1 %v2107_v3  ;;  %v2040_v0 = vld [vmem:[%s2530_s1 + $0xd8] sm:$0xff]   ;;  %v2042_v8 = vld [vmem:[%s2530_s1 + $0xe0] sm:$0xff]   ;;  %v2043_v9 = vld [vmem:[%s2530_s1 + $0xa8] sm:$0xff]   ;;  %vm1409_vm9 = vcmask 130048   ;;  %vm1521_vm10 = vcmask 1043456   ;;  %vm1517_vm11 = vcmask 64512  }
  0x2a   :  { %1834 = vmatprep.subr.bf16.mxu0 %v2107_v3  ;;  %v2044_v10 = vld [vmem:[%s2530_s1 + $0xe8] sm:$0xff]   ;;  %v2045_v12 = vld [vmem:[%s2530_s1 + $0xb0] sm:$0xff]   ;;  %vm1565_vm12 = vcmask 9216  }
  0x2b   :  { %v2046_v13 = vld [vmem:[%s2530_s1 + $0xf0] sm:$0xff]  }
  0x2c   :  { %1807 = vmatpush3.bf16.msra.mxu1 %v2029_v19  ;;  %v2047_v19 = vld [vmem:[%s2530_s1 + $0xb8] sm:$0xff]  }
  0x2d   :  { %1835 = vmatpush3.bf16.msra.mxu0 %v2030_v20  ;;  %1808 = vmatprep.subr.bf16.mxu1 %v2107_v3  ;;  %v2048_v20 = vld [vmem:[%s2530_s1 + $0xf8] sm:$0xff]  }
  0x2e   :  { %1836 = vmatprep.subr.bf16.mxu0 %v2107_v3 }
  0x30   :  { %1809 = vmatpush3.bf16.msra.mxu1 %v2031_v21 }
  0x31   :  { %1837 = vmatpush3.bf16.msra.mxu0 %v2032_v22  ;;  %1810 = vmatprep.subr.bf16.mxu1 %v2107_v3 }
  0x32   :  { %1838 = vmatprep.subr.bf16.mxu0 %v2107_v3 }
  0x34   :  { %1811 = vmatpush3.bf16.msra.mxu1 %v2033_v23  ;;  %v2049_v23 = vld [vmem:[%s2530_s1 + $0xc0] sm:$0xff]  }
  0x35   :  { %1839 = vmatpush3.bf16.msra.mxu0 %v2034_v24  ;;  %1812 = vmatprep.subr.bf16.mxu1 %v2107_v3  ;;  %v2050_v24 = vld [vmem:[%s2530_s1 + $0x100] sm:$0xff]  }
  0x36   :  { %1840 = vmatprep.subr.bf16.mxu0 %v2107_v3 }
  0x38   :  { %1813 = vmatpush3.bf16.msra.mxu1 %v2035_v25 }
  0x39   :  { %1841 = vmatpush3.bf16.msra.mxu0 %v2036_v26  ;;  %1854 = vmatprep.subr.bf16.mxu1 %v2107_v3 }
  0x3a   :  { %1882 = vmatprep.subr.bf16.mxu0 %v2107_v3 }
  0xdd   :  { %v1784_v28 = vpop.f32.mrb[0].mxu0 }
  0xde   :  { %v161_v29 = vadd.f32 %v1784_v28, %v2245_v27  ;;  %v152_v30 = vpop.f32.mrb[1].mxu0  ;;  %v2052_v28 = vld [vmem:[%s2530_s1 + $0x108] sm:$0xff]  }
  0xdf   :  { %v153_v31 = vadd.f32 %v2245_v27, %v152_v30  ;;  %v1785_v32 = vpop.f32.mrb[2].mxu0 }
  0xe0   :  { %219 = vst [vmem:[#allocation2 + $0x12] sm:$0xff] %v161_v29  ;;  %v164_v33 = vadd.f32 %v1785_v32, %v2245_v27  ;;  %v155_v34 = vpop.f32.mrb[3].mxu0 }
  0xe1   :  { %217 = vst [vmem:[#allocation2 + $0x2] sm:$0xff] %v153_v31  ;;  %v156_v35 = vadd.f32 %v2245_v27, %v155_v34 }
  0xe2   :  { %220 = vst [vmem:[#allocation2 + $0x1a] sm:$0xff] %v164_v33 }
  0xe3   :  { %218 = vst [vmem:[#allocation2 + $0xa] sm:$0xff] %v156_v35 }
  0xe5   :  { %v1788_v36 = vpop.f32.mrb[4].mxu0 }
  0xe6   :  { %v177_v37 = vadd.f32 %v1788_v36, %v2245_v27  ;;  %v168_v38 = vpop.f32.mrb[5].mxu0 }
  0xe7   :  { %v169_v39 = vadd.f32 %v2245_v27, %v168_v38  ;;  %v1789_v40 = vpop.f32.mrb[6].mxu0 }
  0xe8   :  { %223 = vst [vmem:[#allocation2 + $0x32] sm:$0xff] %v177_v37  ;;  %v180_v41 = vadd.f32 %v1789_v40, %v2245_v27  ;;  %v171_v42 = vpop.f32.mrb[7].mxu0 }
  0xe9   :  { %221 = vst [vmem:[#allocation2 + $0x22] sm:$0xff] %v169_v39  ;;  %v172_v43 = vadd.f32 %v2245_v27, %v171_v42 }
  0xea   :  { %224 = vst [vmem:[#allocation2 + $0x3a] sm:$0xff] %v180_v41  ;;  %v264_v52 = vld [vmem:[#allocation2 + $0x1] ss:$4 sm:$0xff]  ;;  %v235_v56 = vld [vmem:[#allocation2] ss:$4 sm:$0xff] }
  0xeb   :  { %222 = vst [vmem:[#allocation2 + $0x2a] sm:$0xff] %v172_v43  ;;  %v501_v31 = vld [vmem:[#allocation2 + $0x2] ss:$4 sm:$0xff]  ;;  %v639_v32 = vld [vmem:[#allocation2 + $0x3] ss:$4 sm:$0xff] }
  0xed   :  { %v1792_v44 = vpop.f32.mrb[8].mxu0 }
  0xee   :  { %v193_v45 = vadd.f32 %v1792_v44, %v2245_v27  ;;  %v184_v46 = vpop.f32.mrb[9].mxu0 }
  0xef   :  { %v185_v47 = vadd.f32 %v2245_v27, %v184_v46  ;;  %v1793_v48 = vpop.f32.mrb[10].mxu0  ;;  %v2053_v46 = vld [vmem:[%s2530_s1 + $0x130] sm:$0xff]  }
  0xf0   :  { %229 = vst [vmem:[#allocation2 + $0x56] sm:$0xff] %v193_v45  ;;  %v196_v49 = vadd.f32 %v1793_v48, %v2245_v27  ;;  %v187_v50 = vpop.f32.mrb[11].mxu0  ;;  %v2054_v45 = vld [vmem:[%s2530_s1 + $0x110] sm:$0xff]   ;;  %v2055_v48 = vld [vmem:[%s2530_s1 + $0x138] sm:$0xff]  }
  0xf1   :  { %227 = vst [vmem:[#allocation2 + $0x46] sm:$0xff] %v185_v47  ;;  %v188_v51 = vadd.f32 %v2245_v27, %v187_v50  ;;  %v2056_v47 = vld [vmem:[%s2530_s1 + $0x118] sm:$0xff]   ;;  %v2058_v50 = vld [vmem:[%s2530_s1 + $0x140] sm:$0xff]  }
  0xf2   :  { %230 = vst [vmem:[#allocation2 + $0x5e] sm:$0xff] %v196_v49  ;;  %v266_v55 = vld [vmem:[#allocation2 + $0x21] ss:$4 sm:$0xff]  ;;  %v237_v57 = vld [vmem:[#allocation2 + $0x20] ss:$4 sm:$0xff] }
  0xf3   :  { %228 = vst [vmem:[#allocation2 + $0x4e] sm:$0xff] %v188_v51  ;;  %v273_v58 = vpack.c.bf16 %v266_v55, %v264_v52  ;;  %v244_v59 = vpack.c.bf16 %v237_v57, %v235_v56  ;;  %v503_v29 = vld [vmem:[#allocation2 + $0x22] ss:$4 sm:$0xff]  ;;  %v641_v30 = vld [vmem:[#allocation2 + $0x23] ss:$4 sm:$0xff] }
  0xf4   :  { %v510_v33 = vpack.c.bf16 %v503_v29, %v501_v31  ;;  %v648_v34 = vpack.c.bf16 %v641_v30, %v639_v32  ;;  %v2057_v49 = vld [vmem:[%s2530_s1 + $0x120] sm:$0xff]   ;;  %v2059_v51 = vld [vmem:[%s2530_s1 + $0x128] sm:$0xff]  }
  0xf5   :  { %v1796_v60 = vpop.f32.mrb[12].mxu0  ;;  %1815 = vmatmul.mubr.bf16.vlgmr.msra.gmra.mrb[0].mxu1 %v273_v58  ;;  %1843 = vmatmul.mubr.bf16.vlgmr.msra.gmra.mrb[16].mxu0 %v244_v59  ;;  %v2060_v52 = vld [vmem:[%s2530_s1 + $0x148] sm:$0xff]  }
  0xf6   :  { %v209_v61 = vadd.f32 %v1796_v60, %v2245_v27  ;;  %v200_v62 = vpop.f32.mrb[13].mxu0  ;;  %1855 = vmatpush3.bf16.msra.mxu1 %v2037_v53  ;;  %1883 = vmatpush3.bf16.msra.mxu0 %v2038_v54 }
  0xf7   :  { %v201_v1 = vadd.f32 %v2245_v27, %v200_v62  ;;  %v1797_v2 = vpop.f32.mrb[14].mxu0  ;;  %1856 = vmatprep.subr.bf16.mxu1 %v2107_v3  ;;  %1884 = vmatprep.subr.bf16.mxu0 %v2107_v3 }
  0xf8   :  { %233 = vst [vmem:[#allocation2 + $0x76] sm:$0xff] %v209_v61  ;;  %v212_v4 = vadd.f32 %v1797_v2, %v2245_v27  ;;  %v203_v5 = vpop.f32.mrb[15].mxu0  ;;  %1818 = vmatprep.mubr.msk.bf16.mxu1 %vm2108_vm1, %v2107_v3  ;;  %1846 = vmatprep.mubr.msk.bf16.mxu0 %vm2108_vm1, %v2107_v3 }
  0xf9   :  { %231 = vst [vmem:[#allocation2 + $0x66] sm:$0xff] %v201_v1  ;;  %v204_v6 = vadd.f32 %v2245_v27, %v203_v5  ;;  %v2051_v27 = vld [vmem:[%s2530_s1 + $0xc8] sm:$0xff]  }
  0xfa   :  { %234 = vst [vmem:[#allocation2 + $0x7e] sm:$0xff] %v212_v4  ;;  %1857 = vmatpush3.bf16.msra.mxu1 %v2039_v63  ;;  %1885 = vmatpush3.bf16.msra.mxu0 %v2040_v0  ;;  %v268_v11 = vld [vmem:[#allocation2 + $0x41] ss:$4 sm:$0xff]  ;;  %v239_v15 = vld [vmem:[#allocation2 + $0x40] ss:$4 sm:$0xff] }
  0xfb   :  { %232 = vst [vmem:[#allocation2 + $0x6e] sm:$0xff] %v204_v6  ;;  %1858 = vmatprep.subr.bf16.mxu1 %v2107_v3  ;;  %1886 = vmatprep.subr.bf16.mxu0 %v2107_v3  ;;  %v505_v37 = vld [vmem:[#allocation2 + $0x42] ss:$4 sm:$0xff]  ;;  %v643_v38 = vld [vmem:[#allocation2 + $0x43] ss:$4 sm:$0xff] }
  0xfe   :  { %1859 = vmatpush3.bf16.msra.mxu1 %v2041_v7  ;;  %1887 = vmatpush3.bf16.msra.mxu0 %v2042_v8 }
  0xff   :  { %1860 = vmatprep.subr.bf16.mxu1 %v2107_v3  ;;  %1888 = vmatprep.subr.bf16.mxu0 %v2107_v3 }
 0x101   :  { %v272_v21 = vld [vmem:[#allocation2 + $0x81] ss:$4 sm:$0x3]  ;;  %v243_v22 = vld [vmem:[#allocation2 + $0x80] ss:$4 sm:$0x3] }
 0x102   :  { %1861 = vmatpush3.bf16.msra.mxu1 %v2043_v9  ;;  %1889 = vmatpush3.bf16.msra.mxu0 %v2044_v10  ;;  %v270_v14 = vld [vmem:[#allocation2 + $0x61] ss:$4 sm:$0xff]  ;;  %v241_v16 = vld [vmem:[#allocation2 + $0x60] ss:$4 sm:$0xff]  ;;  %v275_v25 = vpack.c.bf16 %v272_v21, %v272_v21  ;;  %v246_v26 = vpack.c.bf16 %v243_v22, %v243_v22  ;;  %v507_v35 = vld [vmem:[#allocation2 + $0x62] ss:$4 sm:$0xff] }
 0x103   :  { %v274_v17 = vpack.c.bf16 %v270_v14, %v268_v11  ;;  %v245_v18 = vpack.c.bf16 %v241_v16, %v239_v15  ;;  %1862 = vmatprep.subr.bf16.mxu1 %v2107_v3  ;;  %1890 = vmatprep.subr.bf16.mxu0 %v2107_v3  ;;  %v645_v36 = vld [vmem:[#allocation2 + $0x63] ss:$4 sm:$0xff]  ;;  %v511_v39 = vpack.c.bf16 %v507_v35, %v505_v37  ;;  %v509_v41 = vld [vmem:[#allocation2 + $0x82] ss:$4 sm:$0x3] }
 0x104   :  { %v649_v40 = vpack.c.bf16 %v645_v36, %v643_v38  ;;  %v647_v42 = vld [vmem:[#allocation2 + $0x83] ss:$4 sm:$0x3]  ;;  %v512_v43 = vpack.c.bf16 %v509_v41, %v509_v41 }
 0x105   :  { %1819 = vmatmul.mubr.bf16.gmra.mrb[4].mxu1 %v274_v17  ;;  %1847 = vmatmul.mubr.bf16.gmra.mrb[20].mxu0 %v245_v18  ;;  %v650_v44 = vpack.c.bf16 %v647_v42, %v647_v42 }
 0x106   :  { %1863 = vmatpush3.bf16.msra.mxu1 %v2045_v12  ;;  %1891 = vmatpush3.bf16.msra.mxu0 %v2046_v13 }
 0x107   :  { %1864 = vmatprep.subr.bf16.mxu1 %v2107_v3  ;;  %1892 = vmatprep.subr.bf16.mxu0 %v2107_v3 }
 0x108   :  { %1822 = vmatprep.mubr.msk.bf16.mxu1 %vm2108_vm1, %v2107_v3  ;;  %1850 = vmatprep.mubr.msk.bf16.mxu0 %vm2108_vm1, %v2107_v3 }
 0x10a   :  { %1865 = vmatpush3.bf16.msra.mxu1 %v2047_v19  ;;  %1893 = vmatpush3.bf16.msra.mxu0 %v2048_v20 }
 0x10b   :  { %1866 = vmatprep.subr.bf16.mxu1 %v2107_v3  ;;  %1894 = vmatprep.subr.bf16.mxu0 %v2107_v3 }
 0x10d   :  { %1823 = vmatmul.mubr.bf16.gmra.mrb[8].mxu1 %v275_v25  ;;  %1851 = vmatmul.mubr.bf16.gmra.mrb[24].mxu0 %v246_v26 }
 0x10e   :  { %1867 = vmatpush3.bf16.msra.mxu1 %v2049_v23  ;;  %1895 = vmatpush3.bf16.msra.mxu0 %v2050_v24  ;;  %v1643_v24 = vld [vmem:[%s2531_s2 + $0x1] ss:$0 sm:$0xff] }
 0x10f   :  { %1868 = vmatprep.subr.bf16.mxu1 %v2107_v3  ;;  %1896 = vmatprep.subr.bf16.mxu0 %v2107_v3 }
 0x110   :  { %1870 = vmatprep.mubr.msk.bf16.mxu1 %vm2108_vm1, %v2107_v3  ;;  %1898 = vmatprep.mubr.msk.bf16.mxu0 %vm2108_vm1, %v2107_v3 }
 0x112   :  { %1869 = vmatpush3.bf16.msra.mxu1 %v2051_v27  ;;  %1897 = vmatpush3.bf16.msra.mxu0 %v2052_v28 }
 0x113   :  { %1910 = vmatprep.subr.bf16.mxu1 %v2107_v3  ;;  %1922 = vmatprep.subr.bf16.mxu0 %v2107_v3 }
 0x115   :  { %1871 = vmatmul.mubr.bf16.vlgmr.msra.gmra.mrb[12].mxu1 %v510_v33  ;;  %1899 = vmatmul.mubr.bf16.vlgmr.msra.gmra.mrb[28].mxu0 %v648_v34 }
 0x116   :  { %1874 = vmatprep.mubr.msk.bf16.mxu1 %vm2108_vm1, %v2107_v3  ;;  %1902 = vmatprep.mubr.msk.bf16.mxu0 %vm2108_vm1, %v2107_v3 }
 0x117   :  { %1923 = vmatpush3.bf16.msra.mxu0 %v2054_v45  ;;  %1911 = vmatpush3.bf16.msra.mxu1 %v2053_v46 }
 0x118   :  { %1924 = vmatprep.subr.bf16.mxu0 %v2107_v3  ;;  %1912 = vmatprep.subr.bf16.mxu1 %v2107_v3 }
 0x11b   :  { %1925 = vmatpush3.bf16.msra.mxu0 %v2056_v47  ;;  %1913 = vmatpush3.bf16.msra.mxu1 %v2055_v48 }
 0x11c   :  { %1926 = vmatprep.subr.bf16.mxu0 %v2107_v3  ;;  %1914 = vmatprep.subr.bf16.mxu1 %v2107_v3 }
 0x11d   :  { %1875 = vmatmul.mubr.bf16.gmra.mrb[16].mxu1 %v511_v39  ;;  %1903 = vmatmul.mubr.bf16.gmra.mrb[32].mxu0 %v649_v40 }
 0x11e   :  { %1878 = vmatprep.mubr.msk.bf16.mxu1 %vm2108_vm1, %v2107_v3  ;;  %1906 = vmatprep.mubr.msk.bf16.mxu0 %vm2108_vm1, %v2107_v3 }
 0x11f   :  { %1927 = vmatpush3.bf16.msra.mxu0 %v2057_v49  ;;  %1915 = vmatpush3.bf16.msra.mxu1 %v2058_v50 }
 0x120   :  { %1928 = vmatprep.subr.bf16.mxu0 %v2107_v3  ;;  %1916 = vmatprep.subr.bf16.mxu1 %v2107_v3 }
 0x123   :  { %1929 = vmatpush3.bf16.msra.mxu0 %v2059_v51  ;;  %1917 = vmatpush3.bf16.msra.mxu1 %v2060_v52 }
 0x124   :  { %1946 = vmatprep.subr.bf16.mxu0 %v2107_v3  ;;  %1934 = vmatprep.subr.bf16.mxu1 %v2107_v3 }
 0x125   :  { %1879 = vmatmul.mubr.bf16.gmra.mrb[20].mxu1 %v512_v43  ;;  %1907 = vmatmul.mubr.bf16.gmra.mrb[36].mxu0 %v650_v44 }
 0x126   :  { %1930 = vmatprep.mubr.msk.bf16.mxu0 %vm2108_vm1, %v2107_v3  ;;  %1918 = vmatprep.mubr.msk.bf16.mxu1 %vm2108_vm1, %v2107_v3 }
 0x1c8   :  { %v374_v53 = vpop.f32.mrb[0].mxu1  ;;  %v478_v54 = vpop.f32.mrb[16].mxu0 }
 0x1c9   :  { %v479_v55 = vadd.f32 %v478_v54, %v374_v53  ;;  %v1816_v56 = vpop.f32.mrb[1].mxu1  ;;  %v1844_v57 = vpop.f32.mrb[17].mxu0 }
 0x1ca   :  { %v377_v58 = vpop.f32.mrb[2].mxu1  ;;  %v481_v59 = vpop.f32.mrb[18].mxu0 }
 0x1cb   :  { %v482_v60 = vadd.f32 %v481_v59, %v377_v58  ;;  %v1817_v61 = vpop.f32.mrb[3].mxu1  ;;  %v1845_v62 = vpop.f32.mrb[19].mxu0 }
 0x1cc   :  { %v2061_v61 = vld [vmem:[%s2530_s1 + $0x170] sm:$0xff]  }
 0x1d8   :  { %v382_v63 = vpop.f32.mrb[4].mxu1  ;;  %v486_v0 = vpop.f32.mrb[20].mxu0 }
 0x1d9   :  { %v487_v1 = vadd.f32 %v486_v0, %v382_v63  ;;  %v1820_v2 = vpop.f32.mrb[5].mxu1  ;;  %v1848_v4 = vpop.f32.mrb[21].mxu0  ;;  %v2062_v63 = vld [vmem:[%s2530_s1 + $0x178] sm:$0xff]  }
 0x1da   :  { %v385_v5 = vpop.f32.mrb[6].mxu1  ;;  %v489_v6 = vpop.f32.mrb[22].mxu0  ;;  %v2063_v2 = vld [vmem:[%s2530_s1 + $0x150] sm:$0xff]  }
 0x1db   :  { %v490_v7 = vadd.f32 %v489_v6, %v385_v5  ;;  %v1821_v8 = vpop.f32.mrb[7].mxu1  ;;  %v1849_v9 = vpop.f32.mrb[23].mxu0  ;;  %v2064_v5 = vld [vmem:[%s2530_s1 + $0x180] sm:$0xff]   ;;  %v2065_v6 = vld [vmem:[%s2530_s1 + $0x158] sm:$0xff]  }
 0x1dc   :  { %v2067_v8 = vld [vmem:[%s2530_s1 + $0x160] sm:$0xff]  }
 0x1e0   :  { %v390_v10 = vpop.f32.mrb[8].mxu1  ;;  %v494_v11 = vpop.f32.mrb[24].mxu0 }
 0x1e1   :  { %v495_v12 = vadd.f32 %v494_v11, %v390_v10  ;;  %v1824_v13 = vpop.f32.mrb[9].mxu1  ;;  %v1852_v14 = vpop.f32.mrb[25].mxu0 }
 0x1e2   :  { %v393_v15 = vpop.f32.mrb[10].mxu1  ;;  %v497_v16 = vpop.f32.mrb[26].mxu0 }
 0x1e3   :  { %v1825_v17 = vpop.f32.mrb[11].mxu1  ;;  %v1853_v18 = vpop.f32.mrb[27].mxu0  ;;  %v2069_v16 = vld [vmem:[%s2530_s1 + $0x1a0] sm:$0xff]  }
 0x1e4   :  { %v2070_v17 = vld [vmem:[%s2530_s1 + $0x190] sm:$0xff]   ;;  %v2071_v18 = vld [vmem:[%s2530_s1 + $0x1a8] sm:$0xff]  }
 0x1e8   :  { %v611_v19 = vpop.f32.mrb[12].mxu1  ;;  %v749_v20 = vpop.f32.mrb[28].mxu0 }
 0x1e9   :  { %v633_v21 = vadd.f32 %v611_v19, %v479_v55  ;;  %v1872_v22 = vpop.f32.mrb[13].mxu1  ;;  %v1900_v23 = vpop.f32.mrb[29].mxu0  ;;  %v2072_v19 = vld [vmem:[%s2530_s1 + $0x198] sm:$0xff]  }
 0x1ea   :  { %v614_v25 = vpop.f32.mrb[14].mxu1  ;;  %v752_v26 = vpop.f32.mrb[30].mxu0 }
 0x1eb   :  { %v771_v27 = vadd.f32 %v749_v20, %v633_v21  ;;  %v634_v28 = vadd.f32 %v614_v25, %v482_v60  ;;  %v1873_v29 = vpop.f32.mrb[15].mxu1  ;;  %v1901_v30 = vpop.f32.mrb[31].mxu0 }
 0x1ed   :  { %v781_v31 = vadd.f32 %v1643_v24, %v771_v27  ;;  %v772_v32 = vadd.f32 %v752_v26, %v634_v28 }
 0x1ef   :  { %791 = vst.msk [vmem:[#allocation3 + $0x2] sm:$0xff] %vm790_vm4, %v781_v31  ;;  %v782_v33 = vadd.f32 %v1643_v24, %v772_v32 }
 0x1f0   :  { %v619_v34 = vpop.f32.mrb[16].mxu1  ;;  %v757_v35 = vpop.f32.mrb[32].mxu0 }
 0x1f1   :  { %792 = vst.msk [vmem:[#allocation3 + $0xa] sm:$0xff] %vm790_vm4, %v782_v33  ;;  %v635_v36 = vadd.f32 %v619_v34, %v487_v1  ;;  %v1876_v37 = vpop.f32.mrb[17].mxu1  ;;  %v1904_v38 = vpop.f32.mrb[33].mxu0 }
 0x1f2   :  { %v622_v39 = vpop.f32.mrb[18].mxu1  ;;  %v760_v40 = vpop.f32.mrb[34].mxu0  ;;  %v1664_v37 = vld [vmem:[%s2531_s2 + $0x2] ss:$0 sm:$0xff] }
 0x1f3   :  { %v773_v41 = vadd.f32 %v757_v35, %v635_v36  ;;  %v636_v42 = vadd.f32 %v622_v39, %v490_v7  ;;  %v1877_v43 = vpop.f32.mrb[19].mxu1  ;;  %v1905_v44 = vpop.f32.mrb[35].mxu0  ;;  %v2066_v7 = vld [vmem:[%s2530_s1 + $0x188] sm:$0xff]  }
 0x1f5   :  { %v783_v45 = vadd.f32 %v1643_v24, %v773_v41  ;;  %v774_v46 = vadd.f32 %v760_v40, %v636_v42 }
 0x1f7   :  { %793 = vst.msk [vmem:[#allocation3 + $0x12] sm:$0x1] %vm788_vm2, %v783_v45  ;;  %v784_v47 = vadd.f32 %v1643_v24, %v774_v46  ;;  %v2074_v46 = vld [vmem:[%s2530_s1 + $0x1c0] sm:$0xff]  }
 0x1f8   :  { %797 = vst.msk [vmem:[#allocation3 + $0x15] sm:$0xfe] %vm796_vm5, %v783_v45  ;;  %v627_v48 = vpop.f32.mrb[20].mxu1  ;;  %v765_v49 = vpop.f32.mrb[36].mxu0  ;;  %v2073_v45 = vld [vmem:[%s2530_s1 + $0x1b0] sm:$0xff]  }
 0x1f9   :  { %798 = vst.msk [vmem:[#allocation3 + $0x1d] sm:$0xff] %vm790_vm4, %v784_v47  ;;  %v637_v50 = vadd.f32 %v627_v48, %v495_v12  ;;  %v1880_v51 = vpop.f32.mrb[21].mxu1  ;;  %v1908_v52 = vpop.f32.mrb[37].mxu0  ;;  %v2068_v12 = vld [vmem:[%s2530_s1 + $0x168] sm:$0xff]  }
 0x1fa   :  { %v630_v53 = vpop.f32.mrb[22].mxu1  ;;  %v768_v54 = vpop.f32.mrb[38].mxu0  ;;  %v2075_v51 = vld [vmem:[%s2530_s1 + $0x1b8] sm:$0xff]   ;;  %v2076_v52 = vld [vmem:[%s2530_s1 + $0x1c8] sm:$0xff]  }
 0x1fb   :  { %v775_v55 = vadd.f32 %v765_v49, %v637_v50  ;;  %v1881_v56 = vpop.f32.mrb[23].mxu1  ;;  %v1909_v57 = vpop.f32.mrb[39].mxu0 }
 0x1fc   :  { %v2077_v57 = vld [vmem:[%s2530_s1 + $0x1d0] sm:$0xff]  }
 0x1fd   :  { %v785_v58 = vadd.f32 %v1643_v24, %v775_v55 }
 0x1ff   :  { %799 = vst.msk [vmem:[#allocation3 + $0x25] sm:$0x3] %vm786_vm3, %v785_v58  ;;  %v800_v59 = vld [vmem:[#allocation3] ss:$4 sm:$0xff] }
 0x200   :  { %v802_v60 = vld [vmem:[#allocation3 + $0x20] ss:$4 sm:$0x3]  ;;  %v813_v0 = vld [vmem:[#allocation3 + $0x1] ss:$4 sm:$0xff] }
 0x201   :  { %v803_v62 = vpack.c.bf16 %v802_v60, %v800_v59  ;;  %v1045_v9 = vld [vmem:[#allocation3 + $0x3] ss:$4 sm:$0xff]  ;;  %v962_v14 = vld [vmem:[#allocation3 + $0x2] ss:$4 sm:$0xff] }
 0x202   :  { %v1047_v10 = vld [vmem:[#allocation3 + $0x23] ss:$4 sm:$0x3]  ;;  %v2078_v58 = vld [vmem:[%s2530_s1 + $0x1d8] sm:$0xff]  }
 0x203   :  { %1931 = vmatmul.mubr.msk.bf16.vlgmr.msra.gmra.mrb[40].mxu0 %vm790_vm4, %v803_v62  ;;  %v1048_v11 = vpack.c.bf16 %v1047_v10, %v1045_v9  ;;  %v1677_v10 = vld [vmem:[%s2531_s2 + $0x3] ss:$0 sm:$0xff] }
 0x204   :  { %1947 = vmatpush3.bf16.msra.mxu0 %v2061_v61  ;;  %1954 = vmatprep.mubr.msk.bf16.mxu0 %vm2108_vm1, %v2107_v3 }
 0x205   :  { %1948 = vmatprep.subr.bf16.mxu0 %v2107_v3 }
 0x206   :  { %v815_v1 = vld [vmem:[#allocation3 + $0x21] ss:$4 sm:$0x3]  ;;  %v964_v13 = vld [vmem:[#allocation3 + $0x22] ss:$4 sm:$0x3] }
 0x207   :  { %v816_v4 = vpack.c.bf16 %v815_v1, %v813_v0  ;;  %v965_v15 = vpack.c.bf16 %v964_v13, %v962_v14 }
 0x208   :  { %1949 = vmatpush3.bf16.msra.mxu0 %v2062_v63 }
 0x209   :  { %1919 = vmatmul.mubr.msk.bf16.vlgmr.msra.gmra.mrb[24].mxu1 %vm790_vm4, %v816_v4  ;;  %1950 = vmatprep.subr.bf16.mxu0 %v2107_v3 }
 0x20a   :  { %1935 = vmatpush3.bf16.msra.mxu1 %v2063_v2  ;;  %1942 = vmatprep.mubr.msk.bf16.mxu1 %vm2108_vm1, %v2107_v3 }
 0x20b   :  { %1936 = vmatprep.subr.bf16.mxu1 %v2107_v3 }
 0x20c   :  { %1951 = vmatpush3.bf16.msra.mxu0 %v2064_v5 }
 0x20d   :  { %1952 = vmatprep.subr.bf16.mxu0 %v2107_v3 }
 0x20e   :  { %1937 = vmatpush3.bf16.msra.mxu1 %v2065_v6 }
 0x20f   :  { %1938 = vmatprep.subr.bf16.mxu1 %v2107_v3 }
 0x210   :  { %1953 = vmatpush3.bf16.msra.mxu0 %v2066_v7 }
 0x211   :  { %1966 = vmatprep.subr.bf16.mxu0 %v2107_v3 }
 0x212   :  { %1939 = vmatpush3.bf16.msra.mxu1 %v2067_v8 }
 0x213   :  { %1955 = vmatmul.mubr.msk.bf16.vlgmr.msra.gmra.mrb[44].mxu0 %vm790_vm4, %v1048_v11  ;;  %1940 = vmatprep.subr.bf16.mxu1 %v2107_v3 }
 0x214   :  { %1970 = vmatprep.mubr.msk.bf16.mxu0 %vm2108_vm1, %v2107_v3  ;;  %1967 = vmatpush3.bf16.msra.mxu0 %v2070_v17 }
 0x215   :  { %1968 = vmatprep.subr.bf16.mxu0 %v2107_v3 }
 0x216   :  { %1941 = vmatpush3.bf16.msra.mxu1 %v2068_v12 }
 0x217   :  { %1958 = vmatprep.subr.bf16.mxu1 %v2107_v3 }
 0x218   :  { %1969 = vmatpush3.bf16.msra.mxu0 %v2072_v19 }
 0x219   :  { %1943 = vmatmul.mubr.msk.bf16.vlgmr.msra.gmra.mrb[28].mxu1 %vm790_vm4, %v965_v15  ;;  %1982 = vmatprep.subr.bf16.mxu0 %v2107_v3 }
 0x21a   :  { %1962 = vmatprep.mubr.msk.bf16.mxu1 %vm2108_vm1, %v2107_v3  ;;  %1959 = vmatpush3.bf16.msra.mxu1 %v2069_v16 }
 0x21b   :  { %1960 = vmatprep.subr.bf16.mxu1 %v2107_v3 }
 0x21e   :  { %1961 = vmatpush3.bf16.msra.mxu1 %v2071_v18  ;;  %v1510_v18 = vld [vmem:[%s2530_s1 + $0x1e0] sm:$0xf] }
 0x21f   :  { %1974 = vmatprep.subr.bf16.mxu1 %v2107_v3  ;;  %v1523_v19 = vsel %vm1521_vm10, %v1510_v18, 0 }
 0x2d6   :  { %v954_v20 = vpop.f32.mrb[40].mxu0 }
 0x2d7   :  { %v1932_v21 = vpop.f32.mrb[41].mxu0 }
 0x2d8   :  { %v957_v22 = vpop.f32.mrb[42].mxu0 }
 0x2d9   :  { %v1933_v23 = vpop.f32.mrb[43].mxu0 }
 0x2dc   :  { %v886_v24 = vpop.f32.mrb[24].mxu1 }
 0x2dd   :  { %v955_v25 = vadd.f32 %v954_v20, %v886_v24  ;;  %v1920_v26 = vpop.f32.mrb[25].mxu1  ;;  %v1678_v20 = vld [vmem:[%s2531_s2 + $0x4] ss:$0 sm:$0xff] }
 0x2de   :  { %v889_v27 = vpop.f32.mrb[26].mxu1 }
 0x2df   :  { %v958_v28 = vadd.f32 %v957_v22, %v889_v27  ;;  %v1921_v29 = vpop.f32.mrb[27].mxu1 }
 0x2e6   :  { %v1118_v30 = vpop.f32.mrb[44].mxu0 }
 0x2e7   :  { %v1956_v31 = vpop.f32.mrb[45].mxu0 }
 0x2e8   :  { %v1121_v32 = vpop.f32.mrb[46].mxu0 }
 0x2e9   :  { %v1957_v33 = vpop.f32.mrb[47].mxu0 }
 0x2ea   :  { %v1684_v33 = vld [vmem:[%s2531_s2 + $0x6] ss:$0 sm:$0xff] }
 0x2ec   :  { %v1035_v34 = vpop.f32.mrb[28].mxu1 }
 0x2ed   :  { %v1042_v35 = vadd.f32 %v1035_v34, %v955_v25  ;;  %v1944_v36 = vpop.f32.mrb[29].mxu1 }
 0x2ee   :  { %v1038_v38 = vpop.f32.mrb[30].mxu1 }
 0x2ef   :  { %v1125_v39 = vadd.f32 %v1118_v30, %v1042_v35  ;;  %v1043_v40 = vadd.f32 %v1038_v38, %v958_v28  ;;  %v1945_v41 = vpop.f32.mrb[31].mxu1 }
 0x2f1   :  { %v1132_v42 = vadd.f32 %v1664_v37, %v1125_v39  ;;  %v1126_v43 = vadd.f32 %v1121_v32, %v1043_v40 }
 0x2f3   :  { %1135 = vst.msk [vmem:[#allocation4] sm:$0xf] %vm1134_vm6, %v1132_v42  ;;  %v1133_v44 = vadd.f32 %v1664_v37, %v1126_v43 }
 0x2f4   :  { %1137 = vst.msk [vmem:[#allocation4 - $0x1] sm:$0xe0] %vm1136_vm7, %v1132_v42 }
 0x2f5   :  { %1139 = vst.msk [vmem:[#allocation4 + $0x7] sm:$0x1] %vm1138_vm8, %v1133_v44 }
 0x2fb   :  { %v1147_v47 = vld [vmem:[#allocation4 + $0x1] ss:$4 sm:$0x3]  ;;  %v1140_v48 = vld [vmem:[#allocation4] ss:$4 sm:$0x3] }
 0x2fc   :  { %v1148_v49 = vpack.c.bf16 %v1147_v47, %v1147_v47  ;;  %v1141_v50 = vpack.c.bf16 %v1140_v48, %v1140_v48  ;;  %v1264_v53 = vld [vmem:[#allocation4 + $0x2] ss:$4 sm:$0x3]  ;;  %v1327_v54 = vld [vmem:[#allocation4 + $0x3] ss:$4 sm:$0x3] }
 0x2fd   :  { %v1265_v55 = vpack.c.bf16 %v1264_v53, %v1264_v53  ;;  %v1328_v56 = vpack.c.bf16 %v1327_v54, %v1327_v54 }
 0x2fe   :  { %1963 = vmatmul.mubr.msk.bf16.vlgmr.msra.gmra.mrb[32].mxu1 %vm93_vm0, %v1148_v49  ;;  %1971 = vmatmul.mubr.msk.bf16.vlgmr.msra.gmra.mrb[48].mxu0 %vm93_vm0, %v1141_v50 }
 0x2ff   :  { %1975 = vmatpush3.bf16.msra.mxu1 %v2073_v45  ;;  %1983 = vmatpush3.bf16.msra.mxu0 %v2074_v46 }
 0x300   :  { %1976 = vmatprep.subr.bf16.mxu1 %v2107_v3  ;;  %1984 = vmatprep.subr.bf16.mxu0 %v2107_v3 }
 0x301   :  { %1978 = vmatprep.mubr.msk.bf16.mxu1 %vm2108_vm1, %v2107_v3  ;;  %1986 = vmatprep.mubr.msk.bf16.mxu0 %vm2108_vm1, %v2107_v3 }
 0x303   :  { %1977 = vmatpush3.bf16.msra.mxu1 %v2075_v51  ;;  %1985 = vmatpush3.bf16.msra.mxu0 %v2076_v52 }
 0x304   :  { %1990 = vmatprep.subr.bf16.mxu1 %v2107_v3  ;;  %1996 = vmatprep.subr.bf16.mxu0 %v2107_v3 }
 0x306   :  { %1979 = vmatmul.mubr.msk.bf16.vlgmr.msra.gmra.mrb[36].mxu1 %vm93_vm0, %v1265_v55  ;;  %1987 = vmatmul.mubr.msk.bf16.vlgmr.msra.gmra.mrb[52].mxu0 %vm93_vm0, %v1328_v56 }
 0x307   :  { %1992 = vmatprep.mubr.msk.bf16.mxu1 %vm2108_vm1, %v2107_v3  ;;  %1998 = vmatprep.mubr.msk.bf16.mxu0 %vm2108_vm1, %v2107_v3 }
 0x308   :  { %1991 = vmatpush3.bf16.msra.mxu1 %v2077_v57  ;;  %1997 = vmatpush3.bf16.msra.mxu0 %v2078_v58 }
 0x309   :  { %2002 = vmatprep.subr.bf16.mxu1 %v2107_v3 }
 0x3d1   :  { %v1202_v59 = vpop.f32.mrb[32].mxu1  ;;  %v1257_v60 = vpop.f32.mrb[48].mxu0 }
 0x3d2   :  { %v1258_v61 = vadd.f32 %v1257_v60, %v1202_v59  ;;  %v1964_v62 = vpop.f32.mrb[33].mxu1  ;;  %v1972_v63 = vpop.f32.mrb[49].mxu0 }
 0x3d3   :  { %v1205_v0 = vpop.f32.mrb[34].mxu1  ;;  %v1260_v1 = vpop.f32.mrb[50].mxu0 }
 0x3d4   :  { %v1965_v2 = vpop.f32.mrb[35].mxu1  ;;  %v1973_v4 = vpop.f32.mrb[51].mxu0 }
 0x3d9   :  { %v1319_v5 = vpop.f32.mrb[36].mxu1  ;;  %v1382_v6 = vpop.f32.mrb[52].mxu0 }
 0x3da   :  { %v1325_v7 = vadd.f32 %v1319_v5, %v1258_v61  ;;  %v1980_v8 = vpop.f32.mrb[37].mxu1  ;;  %v1988_v9 = vpop.f32.mrb[53].mxu0 }
 0x3db   :  { %v1322_v11 = vpop.f32.mrb[38].mxu1  ;;  %v1385_v12 = vpop.f32.mrb[54].mxu0 }
 0x3dc   :  { %v1388_v13 = vadd.f32 %v1382_v6, %v1325_v7  ;;  %v1981_v14 = vpop.f32.mrb[39].mxu1  ;;  %v1989_v15 = vpop.f32.mrb[55].mxu0 }
 0x3de   :  { %v1394_v16 = vadd.f32 %v1677_v10, %v1388_v13 }
 0x3e0   :  { %v1398_v17 = vpack.c.bf16 %v1394_v16, %v1394_v16 }
 0x3e2   :  { %1993 = vmatmul.mubr.msk.bf16.vlgmr.msra.gmra.mrb[40].mxu1 %vm1409_vm9, %v1398_v17 }
 0x3e3   :  { %2004 = vmatprep.mubr.msk.bf16.mxu1 %vm2108_vm1, %v2107_v3  ;;  %2003 = vmatpush3.bf16.msra.mxu1 %v1523_v19  ;;  %v1681_v3 = vld [vmem:[%s2531_s2 + $0x5] ss:$0 sm:$0xff]  ;;  %s2109_s2 = smov [#allocation5]  }
 0x3e4   :  { %s1584_s23 = sshll.u32 %s2109_s2, 4  ;;  %s1585_s23 = int_to_ptr.vmem [resolvable:$true] %s1584_s23 }
 0x3e5   :  { %s2083_s24 = scalar_lea.vmem %s1585_s23, 32  ;;  %p2088_p1 = scmp.lt.s32.totalorder %s1585_s23, %s1585_s23 }
 0x3e6   :  { %p2084_p0 = scmp.ne.s32.totalorder %s1585_s23, %s2083_s24  ;;  %p2089_p2 = scmp.lt.s32.totalorder %s2083_s24, %s2083_s24 }
 0x3e8   :  { %p2090_p3 = por %p2089_p2, %p2088_p1 }
 0x3ea   :  { %p2091_p4 = pnand %p2090_p3, %p2084_p0 }
 0x4b5   :  { %v1447_v21 = vpop.f32.mrb[40].mxu1 }
 0x4b6   :  { %v1448_v22 = vadd.f32 %v1678_v20, %v1447_v21  ;;  %v1994_v23 = vpop.f32.mrb[41].mxu1 }
 0x4b7   :  { %v1450_v24 = vpop.f32.mrb[42].mxu1 }
 0x4b8   :  { %v1456_v25 = vpack.c.bf16 %v1448_v22, %v1448_v22  ;;  %v1995_v26 = vpop.f32.mrb[43].mxu1 }
 0x4ba   :  { %1999 = vmatmul.mubr.msk.bf16.vlgmr.msra.gmra.mrb[56].mxu0 %vm1409_vm9, %v1456_v25 }
 0x58d   :  { %v1504_v27 = vpop.f32.mrb[56].mxu0 }
 0x58e   :  { %v1505_v28 = vadd.f32 %v1681_v3, %v1504_v27  ;;  %v2000_v29 = vpop.f32.mrb[57].mxu0 }
 0x58f   :  { %v1507_v30 = vpop.f32.mrb[58].mxu0 }
 0x590   :  { %v1512_v31 = vpack.c.bf16 %v1505_v28, %v1505_v28  ;;  %v2001_v32 = vpop.f32.mrb[59].mxu0 }
 0x592   :  { %2005 = vmatmul.mubr.msk.bf16.vlgmr.msra.gmra.mrb[44].mxu1 %vm1517_vm11, %v1512_v31 }
 0x665   :  { %v1559_v34 = vpop.f32.mrb[44].mxu1 }
 0x666   :  { %v1560_v35 = vadd.f32 %v1684_v33, %v1559_v34  ;;  %v2006_v36 = vpop.f32.mrb[45].mxu1 }
 0x667   :  { %v1562_v37 = vpop.f32.mrb[46].mxu1 }
 0x668   :  { %v2007_v38 = vpop.f32.mrb[47].mxu1  ;;  %v1566_v39 = vsel %vm1565_vm12, %v1560_v35, -inf }
 0x669   :  { %1567 = vmax.xlane.f32.xlu0 %v1566_v39 }
 0x6f6   :  { %v1568_v40 = vpop.xlane.xlu0 %1567 }
 0x6f7   :  { %v1569_v41 = vsub.f32 %v1560_v35, %v1568_v40 }
 0x6f9   :  { %v1570_v42 = vmul.f32 1.442695, %v1569_v41 }
 0x6fb   :  { %2079 = vpow2.f32 %v1570_v42 }
 0x705   :  { %v2080_v43 = vpop.eup %2079 }
 0x706   :  { %v1572_v44 = vsel %vm1565_vm12, %v2080_v43, 0.0 }
 0x707   :  { %1573 = vadd.xlane.f32.xlu0 %v1572_v44 }
 0x794   :  { %v1574_v45 = vpop.xlane.xlu0 %1573 }
 0x795   :  { %2081 = vrcp.f32 %v1574_v45 }
 0x79f   :  { %v2082_v46 = vpop.eup %2081 }
 0x7a0   :  { %v1576_v47 = vmul.f32 %v2082_v46, %v2080_v43 }
 0x7a2   :  { %1577 = vst.msk [vmem:[#allocation5] sm:$0x3] %vm1565_vm12, %v1576_v47 }
 0x7a3   :  { %2094 = shalt.err (!%p2091_p4)
}
 0x7a4   :  { %s2095_s27 = scalar_lea.hbm %s2532_s3, 32 }
 0x7a5   :  { %p2096_p5 = scmp.ne.s32.totalorder %s2532_s3, %s2095_s27  ;;  %p2099_p6 = scmp.lt.u32.totalorder %s2095_s27, %s2532_s3 }
 0x7a7   :  { %p2101_p7 = pnand %p2099_p6, %p2096_p5 }
 0x7a9   :  { %2104 = shalt.err (!%p2101_p7)
}
 0x7aa   :  { %1587 = dma.vmem_to_hbm [thread:$0]  %s1585_s23, 32, %s2532_s3, [#allocation6]  }
 0x7ab   :  { %2105 = dma.done.wait [#allocation6], 32  }
 0x7ac   :  { %2106 = vsyncadd [#allocation6], 4294967264 }
 0x7ad   :  { %1591 = vsyncpa [#allocation6], 1 }

</bundles_post_ra>
